<compile_context>
chip_gen: v7x
topology: tpu7x:2x2x1
jax: 0.10.0
libtpu: 0.0.40
codegen_flags: <defaults>
</compile_context>

<pallas_src>
import math

import jax
import jax.numpy as jnp
from jax.experimental import pallas as pl
from jax.experimental.pallas import tpu as pltpu


def _mlp_kernel(x_ref, w_ref, b_ref, o_ref):
    """Fused 3-layer MLP forward pass in transposed ([features, batch]) layout.

    x_ref : [16, TN] bf16  (rows 10..15 are zero padding of the 10 input features)
    w_ref : [3, 16, 16] bf16 weight slab (W1 cols 10..15 zero; W3 in row 0 of slab 2)
    b_ref : [3, 16, 1] f32 bias slab     (b3 at [2, 0, 0])
    o_ref : [1, TN] f32 (lane-dense)
    """
    xT = x_ref[...]                                   # [16, TN] bf16

    # Layer 1: Linear(10, 16) + ReLU   (bf16 x bf16 MXU, f32 accumulate)
    h1 = jnp.dot(w_ref[0], xT, preferred_element_type=jnp.float32)       # [16, TN] f32
    h1 = jnp.maximum(h1 + b_ref[0], 0.0)

    # Layer 2: Linear(16, 16) + ReLU   (f32 matmul; MXU is not the bottleneck)
    h2 = jnp.dot(w_ref[1].astype(jnp.float32), h1,
                 preferred_element_type=jnp.float32)                     # [16, TN] f32
    h2 = jnp.maximum(h2 + b_ref[1], 0.0)

    # Layer 3: Linear(16, 1) + Sigmoid
    w3 = w_ref[2][0:1, :].astype(jnp.float32)                            # [1, 16]
    b3 = b_ref[2][0:1, :]                                                # [1, 1]
    z = jnp.dot(w3, h2, preferred_element_type=jnp.float32) + b3         # [1, TN] f32
    o_ref[...] = jax.nn.sigmoid(z)                                       # lane-dense vst


def _choose_batch_tile(padded, cap=1024):
    """Pick TN: a multiple-of-128 divisor of `padded`.

    Prefer an even 2-step grid (one block per TensorCore on v7x); otherwise the
    largest divisor <= cap (cap keeps f32 [16, TN] intermediates under ~32 vregs,
    no spills, no inner sub-chunk loop needed).
    """
    half = padded // 2
    if half >= 128 and half % 128 == 0 and half <= cap:
        return half
    best = 128
    t = 256
    while t <= min(padded, cap):
        if padded % t == 0:
            best = t
        t += 128
    return best


def pack_params(params):
    """Pack the 5 tiny weight/bias tensors into two VMEM-resident slabs (do once)."""
    w_slab = jnp.zeros((3, 16, 16), jnp.float32)
    w_slab = w_slab.at[0, :, :10].set(params["w1"])    # [16, 10] -> padded cols zero
    w_slab = w_slab.at[1].set(params["w2"])            # [16, 16]
    w_slab = w_slab.at[2, 0:1, :].set(params["w3"])    # [1, 16]
    b_slab = jnp.zeros((3, 16, 1), jnp.float32)
    b_slab = b_slab.at[0].set(params["b1"])            # [16, 1]
    b_slab = b_slab.at[1].set(params["b2"])            # [16, 1]
    b_slab = b_slab.at[2, 0:1, :].set(params["b3"])    # [1, 1]
    return {"w_slab": w_slab.astype(jnp.bfloat16), "b_slab": b_slab}


def sequential_nn_forward(x, packed):
    """x: [batch, 10] float32 -> [batch, 1] float32 in (0, 1)."""
    batch, in_features = x.shape
    assert in_features == 10

    padded = pl.cdiv(batch, 128) * 128          # pad only to a multiple of 128
    tn = _choose_batch_tile(padded)
    grid = (padded // tn,)

    # Single fused transpose + pad + cast (one XLA pass, no zero-buffer scatter).
    # Feature rows 10..15 are zero and match the zero columns of the packed W1.
    xT = jnp.pad(x.astype(jnp.bfloat16).T,
                 ((0, 16 - in_features), (0, padded - batch)))           # [16, padded]

    w_slab = packed["w_slab"]                   # [3, 16, 16] bf16
    b_slab = packed["b_slab"]                   # [3, 16, 1]  f32

    flops = 2 * batch * (10 * 16 + 16 * 16 + 16 * 1)
    bytes_accessed = int(xT.size * 2 + padded * 4 + w_slab.size * 2 + b_slab.size * 4)

    out_t = pl.pallas_call(
        _mlp_kernel,
        out_shape=jax.ShapeDtypeStruct((1, padded), jnp.float32),
        grid_spec=pltpu.PrefetchScalarGridSpec(
            num_scalar_prefetch=0,
            grid=grid,
            in_specs=[
                pl.BlockSpec((16, tn), lambda i: (0, i)),        # xT tile (streams)
                pl.BlockSpec((3, 16, 16), lambda i: (0, 0, 0)),  # weight slab (resident)
                pl.BlockSpec((3, 16, 1), lambda i: (0, 0, 0)),   # bias slab (resident)
            ],
            out_specs=pl.BlockSpec((1, tn), lambda i: (0, i)),   # lane-dense output
        ),
        compiler_params=pltpu.CompilerParams(
            dimension_semantics=("parallel",),   # v7x: the 2 TCs split the batch grid
        ),
        cost_estimate=pl.CostEstimate(
            flops=flops, transcendentals=batch, bytes_accessed=bytes_accessed),
    )(xT, w_slab, b_slab)

    # Back to the module's [batch, 1] contract (tiny wrapper slice; padded columns,
    # which carry sigmoid(bias) junk, are dropped here).
    return out_t[0, :batch][:, None]


def init_params(key):
    """PyTorch nn.Linear default init: U(-1/sqrt(fan_in), 1/sqrt(fan_in)).
    Weights kept PyTorch-native [out, in]; biases stored as [out, 1] columns."""
    dims = [(10, 16), (16, 16), (16, 1)]
    params = {}
    keys = jax.random.split(key, 2 * len(dims))
    for i, (fan_in, fan_out) in enumerate(dims):
        bound = 1.0 / math.sqrt(fan_in)
        w = jax.random.uniform(
            keys[2 * i], (fan_out, fan_in), jnp.float32, -bound, bound)
        b = jax.random.uniform(
            keys[2 * i + 1], (fan_out, 1), jnp.float32, -bound, bound)
        params[f"w{i + 1}"] = w
        params[f"b{i + 1}"] = b
    return params


def _reference_forward(x, params):
    """Pure-JAX f32 reference with identical semantics (correctness check)."""
    h = jnp.maximum(x @ params["w1"].T + params["b1"].T, 0.0)
    h = jnp.maximum(h @ params["w2"].T + params["b2"].T, 0.0)
    return jax.nn.sigmoid(h @ params["w3"].T + params["b3"].T)


if __name__ == "__main__":
    key = jax.random.PRNGKey(0)
    pkey, xkey = jax.random.split(key)

    params = init_params(pkey)
    packed = pack_params(params)   # one-time packing, outside the hot path

    # batch=200: ragged (pads to 256), tile=128, grid=(2,) -> exercises the fixed
    # padding policy, the 2-step pipelined grid, and the v7x megacore split.
    batch = 200
    x = jax.random.normal(xkey, (batch, 10), dtype=jnp.float32)

    out = jax.block_until_ready(sequential_nn_forward(x, packed))

    assert out.shape == (batch, 1), out.shape
    assert bool(jnp.all((out > 0.0) & (out < 1.0))), "sigmoid output out of range"

    ref = _reference_forward(x, params)
    max_err = float(jnp.max(jnp.abs(out - ref)))
    assert max_err < 2e-2, f"mismatch vs reference: {max_err}"

    print("KERNEL_OK")
</pallas_src>

<mosaic_0001>
module attributes {stable_mosaic.version = 11 : i64} {
  func.func @_mlp_kernel(%arg0: i32, %arg1: memref<16x128xbf16, #tpu.memory_space<vmem>>, %arg2: memref<3x16x16xbf16, #tpu.memory_space<vmem>>, %arg3: memref<3x16x1xf32, #tpu.memory_space<vmem>>, %arg4: memref<1x128xf32, #tpu.memory_space<vmem>>) attributes {dimension_semantics = [#tpu.dimension_semantics<parallel>], iteration_bounds = array<i64: 2>, scalar_prefetch = 0 : i64, scratch_operands = 0 : i64, tpu.core_type = #tpu.core_type<tc>, window_params = [{transform_indices = @transform_0, window_bounds = array<i64: 16, 128>}, {pipeline_mode = #tpu.pipeline_mode<synchronous>, transform_indices = @transform_1, window_bounds = array<i64: 3, 16, 16>}, {pipeline_mode = #tpu.pipeline_mode<synchronous>, transform_indices = @transform_2, window_bounds = array<i64: 3, 16, 1>}, {transform_indices = @transform_3, window_bounds = array<i64: 1, 128>}]} {
    %c0 = arith.constant 0 : index
    %c0_0 = arith.constant 0 : index
    %0 = vector.load %arg1[%c0, %c0_0] : memref<16x128xbf16, #tpu.memory_space<vmem>>, vector<16x128xbf16>
    %c0_1 = arith.constant 0 : index
    %c0_2 = arith.constant 0 : index
    %c0_3 = arith.constant 0 : index
    %1 = vector.load %arg2[%c0_1, %c0_2, %c0_3] : memref<3x16x16xbf16, #tpu.memory_space<vmem>>, vector<1x16x16xbf16>
    %2 = vector.shape_cast %1 : vector<1x16x16xbf16> to vector<16x16xbf16>
    %cst = arith.constant dense<0.000000e+00> : vector<16x128xf32>
    %3 = tpu.matmul %2, %0, %cst {dimension_numbers = #tpu.dot_dimension_numbers<[1], [0], [0], [1], [0, 0, 1, 1], [], []>} : vector<16x16xbf16>, vector<16x128xbf16>, vector<16x128xf32> -> vector<16x128xf32>
    %c0_4 = arith.constant 0 : index
    %c0_5 = arith.constant 0 : index
    %c0_6 = arith.constant 0 : index
    %4 = vector.load %arg3[%c0_4, %c0_5, %c0_6] : memref<3x16x1xf32, #tpu.memory_space<vmem>>, vector<1x16x1xf32>
    %5 = vector.shape_cast %4 : vector<1x16x1xf32> to vector<16x1xf32>
    %6 = vector.broadcast %5 : vector<16x1xf32> to vector<16x128xf32>
    %7 = arith.addf %3, %6 : vector<16x128xf32>
    %cst_7 = arith.constant 0.000000e+00 : f32
    %8 = vector.broadcast %cst_7 : f32 to vector<16x128xf32>
    %9 = arith.maximumf %7, %8 : vector<16x128xf32>
    %c1 = arith.constant 1 : index
    %c0_8 = arith.constant 0 : index
    %c0_9 = arith.constant 0 : index
    %10 = vector.load %arg2[%c1, %c0_8, %c0_9] : memref<3x16x16xbf16, #tpu.memory_space<vmem>>, vector<1x16x16xbf16>
    %11 = vector.shape_cast %10 : vector<1x16x16xbf16> to vector<16x16xbf16>
    %12 = arith.extf %11 : vector<16x16xbf16> to vector<16x16xf32>
    %cst_10 = arith.constant dense<0.000000e+00> : vector<16x128xf32>
    %13 = tpu.matmul %12, %9, %cst_10 {dimension_numbers = #tpu.dot_dimension_numbers<[1], [0], [0], [1], [0, 0, 1, 1], [], []>} : vector<16x16xf32>, vector<16x128xf32>, vector<16x128xf32> -> vector<16x128xf32>
    %c1_11 = arith.constant 1 : index
    %c0_12 = arith.constant 0 : index
    %c0_13 = arith.constant 0 : index
    %14 = vector.load %arg3[%c1_11, %c0_12, %c0_13] : memref<3x16x1xf32, #tpu.memory_space<vmem>>, vector<1x16x1xf32>
    %15 = vector.shape_cast %14 : vector<1x16x1xf32> to vector<16x1xf32>
    %16 = vector.broadcast %15 : vector<16x1xf32> to vector<16x128xf32>
    %17 = arith.addf %13, %16 : vector<16x128xf32>
    %cst_14 = arith.constant 0.000000e+00 : f32
    %18 = vector.broadcast %cst_14 : f32 to vector<16x128xf32>
    %19 = arith.maximumf %17, %18 : vector<16x128xf32>
    %c2 = arith.constant 2 : index
    %c0_15 = arith.constant 0 : index
    %c0_16 = arith.constant 0 : index
    %20 = vector.load %arg2[%c2, %c0_15, %c0_16] : memref<3x16x16xbf16, #tpu.memory_space<vmem>>, vector<1x16x16xbf16>
    %21 = vector.shape_cast %20 : vector<1x16x16xbf16> to vector<16x16xbf16>
    %22 = vector.extract_strided_slice %21 {offsets = [0, 0], sizes = [1, 16], strides = [1, 1]} : vector<16x16xbf16> to vector<1x16xbf16>
    %23 = arith.extf %22 : vector<1x16xbf16> to vector<1x16xf32>
    %c2_17 = arith.constant 2 : index
    %c0_18 = arith.constant 0 : index
    %c0_19 = arith.constant 0 : index
    %24 = vector.load %arg3[%c2_17, %c0_18, %c0_19] : memref<3x16x1xf32, #tpu.memory_space<vmem>>, vector<1x16x1xf32>
    %25 = vector.shape_cast %24 : vector<1x16x1xf32> to vector<16x1xf32>
    %26 = vector.extract_strided_slice %25 {offsets = [0, 0], sizes = [1, 1], strides = [1, 1]} : vector<16x1xf32> to vector<1x1xf32>
    %cst_20 = arith.constant dense<0.000000e+00> : vector<1x128xf32>
    %27 = tpu.matmul %23, %19, %cst_20 {dimension_numbers = #tpu.dot_dimension_numbers<[1], [0], [0], [1], [0, 0, 1, 1], [], []>} : vector<1x16xf32>, vector<16x128xf32>, vector<1x128xf32> -> vector<1x128xf32>
    %28 = vector.broadcast %26 : vector<1x1xf32> to vector<1x128xf32>
    %29 = arith.addf %27, %28 : vector<1x128xf32>
    %30 = arith.negf %29 : vector<1x128xf32>
    %31 = math.exp %30 : vector<1x128xf32>
    %cst_21 = arith.constant 1.000000e+00 : f32
    %32 = vector.broadcast %cst_21 : f32 to vector<1x128xf32>
    %33 = arith.addf %32, %31 : vector<1x128xf32>
    %34 = arith.divf %32, %33 : vector<1x128xf32>
    %c0_22 = arith.constant 0 : index
    %c0_23 = arith.constant 0 : index
    %35 = vector.load %arg4[%c0_22, %c0_23] : memref<1x128xf32, #tpu.memory_space<vmem>>, vector<1x128xf32>
    tpu.vector_store %arg4[%c0_22, %c0_23], %34 {strides = array<i32>} : memref<1x128xf32, #tpu.memory_space<vmem>>, vector<1x128xf32>,
    return
  }
  func.func @transform_0(%arg0: i32) -> (i32, i32) {
    %c0_i32 = arith.constant 0 : i32
    %c0_i32_0 = arith.constant 0 : i32
    return %c0_i32, %arg0 : i32, i32
  }
  func.func @transform_1(%arg0: i32) -> (i32, i32, i32) {
    %c0_i32 = arith.constant 0 : i32
    %c0_i32_0 = arith.constant 0 : i32
    %c0_i32_1 = arith.constant 0 : i32
    %c0_i32_2 = arith.constant 0 : i32
    return %c0_i32, %c0_i32_0, %c0_i32_1 : i32, i32, i32
  }
  func.func @transform_2(%arg0: i32) -> (i32, i32, i32) {
    %c0_i32 = arith.constant 0 : i32
    %c0_i32_0 = arith.constant 0 : i32
    %c0_i32_1 = arith.constant 0 : i32
    %c0_i32_2 = arith.constant 0 : i32
    return %c0_i32, %c0_i32_0, %c0_i32_1 : i32, i32, i32
  }
  func.func @transform_3(%arg0: i32) -> (i32, i32) {
    %c0_i32 = arith.constant 0 : i32
    %c0_i32_0 = arith.constant 0 : i32
    return %c0_i32, %arg0 : i32, i32
  }
}

</mosaic_0001>

<bundles_post_ra>
// kernel: tpu_custom_call.1
= control target key start
LH: loop header
LB: loop body
LE: loop exit
PB: predicated region body
PF: predicated region fallthrough
CT: control target
= control target key end

     0   :  { %8 = vsyncpa [#allocation4], 0  ;;  %s897_s0 = inlined_call_operand.vmem [shape: bf16[16,256], index: 0, kind: input, shape index: {}]   ;;  %s898_s1 = inlined_call_operand.vmem [shape: bf16[3,16,16], index: 1, kind: input, shape index: {}]   ;;  %s899_s2 = inlined_call_operand.vmem [shape: f32[3,16,1], index: 2, kind: input, shape index: {}]   ;;  %s900_s3 = inlined_call_operand.hbm [shape: f32[1,256], index: 3, kind: output, shape index: {}]  }
   0x1   :  { %10 = vsyncpa [#allocation4 + $0x1], 0  ;;  %s757_s12 = smov 0   ;;  %s759_s13 = smov 0  }
   0x2   :  { %s761_s14 = smov 0   ;;  %s763_s15 = smov 0  }
   0x3 LB: > { %s552_s16 = sadd.s32 4294967295, %s730_s15   ;;  %s553_s17 = sadd.s32 4294967294, %s730_s15   ;;  %s730_s15 = sphi %s763_s15, %s906_s15   ;;  %s726_s14 = sphi %s761_s14, %s905_s14   ;;  %s722_s13 = sphi %s759_s13, %s904_s13   ;;  %s718_s12 = sphi %s757_s12, %s903_s12  }
   0x4   : > { %s780_s18 = sadd.s32 1, %s730_s15   ;;  %s23_s19 = sadd.s32 1, %s726_s14 }
   0x5   : > { %s20_s20 = ssub.s32 %s730_s15, %s780_s18  ;;  %p30_p0 = scmp.ne.s32.totalorder %s726_s14, %s722_s13 }
   0x6   : > { %p21_p1 = scmp.eq.s32.totalorder %s20_s20, 0  ;;  %p31_p2 = scmp.eq.s32.totalorder %s730_s15, 0 }
   0x7   : > { %p102_p3 = scmp.eq.s32.totalorder %s552_s16, 1  ;;  %p107_p4 = scmp.ne.s32.totalorder %s722_s13, %s718_s12 }
   0x8   : > { %s793_s21 = scalar_select %p21_p1, %s726_s14, %s23_s19  }
   0x9   : > { %p32_p5 = por %p31_p2, %p30_p0  ;;  %p795_p6 = por %p102_p3, %p30_p0 }
   0xa   : > { %p108_p7 = scmp.eq.s32.totalorder %s553_s17, 1  ;;  %p555_p9 = scmp.ge.s32.totalorder %s730_s15, 2 }
   0xc   : > { %p799_p8 = por %p108_p7, %p107_p4  ;;  %130 = sbr.rel (%p555_p9) target bundleno = 26 (0x1a), region = 24 }
  0x13   : > { %133 = sbr.rel (!%p32_p5) target bundleno = 26 (0x1a), region = 28  ;;  %s135_s24 = sand.u32 (%p32_p5), 1, %s726_s14  }
  0x14   : > { %s557_s25 = sshll.u32 (%p32_p5), %s730_s15, 2  ;;  %s556_s26 = sshll.u32 (%p32_p5), %s135_s24, 3 }
  0x15   : > { %s139_s29 = scalar_lea.vmem (%p32_p5), %s897_s0, %s557_s25  ;;  %s137_s30 = scalar_lea.vmem (%p32_p5), [#allocation2], %s556_s26 }
  0x16   : > { %v155_v0 = vld [vmem:[%s139_s29] sm:$0xf] (%p32_p5)  ;;  %v157_v1 = vld [vmem:[%s139_s29 + $0x8] sm:$0xf] (%p32_p5) }
  0x17   : > { %156 = vst [vmem:[%s137_s30] sm:$0xf] (%p32_p5), %v155_v0  ;;  %158 = vst [vmem:[%s137_s30 + $0x4] sm:$0xf] (%p32_p5), %v157_v1 }
  0x1a PF: > { %p558_p10 = scmp.ge.s32.totalorder %s730_s15, 1  ;;  %p184_p11 = scmp.lt.s32.totalorder %s730_s15, 3 }
  0x1c   : > { %p185_p12 = pnand %p558_p10, %p184_p11 }
  0x1d   : > { %s814_s4 = sand.u32 (!%p185_p12), 1, %s722_s13   ;;  %v732_v2 = vmov (!%p185_p12), 0.0   ;;  %vm733_vm0 = vmmov (!%p185_p12), 0   ;;  %v218_v3 = vld [vmem:[%s899_s2] sm:$0xff] (!%p185_p12)  ;;  %v734_v4 = vmov (!%p185_p12), 0   ;;  %v219_v7 = vld [vmem:[%s899_s2 + $0x8] sm:$0xff] (!%p185_p12) }
  0x1e   : > { %188 = sbr.rel (%p185_p12) target bundleno = 736 (0x2e0), region = 69  ;;  %590 = vmatprep.subr.bf16.mxu0 (!%p185_p12), %v732_v2  ;;  %s559_s5 = sshll.u32 (!%p185_p12), %s814_s4, 3  ;;  %592 = vmatprep.mubr.msk.bf16.mxu0 (!%p185_p12), %vm733_vm0, %v732_v2  ;;  %v663_v6 = vld [vmem:[%s898_s1] sm:$0xff] (!%p185_p12)   ;;  %vm241_vm1 = vcmask (!%p185_p12), 130048   ;;  %v580_v9 = vld [vmem:[%s898_s1 + $0x8] sm:$0xff] (!%p185_p12)   ;;  %v565_v11 = vld [vmem:[%s899_s2 + $0x10] sm:$0xff] (!%p185_p12) }
  0x1f   : > { %660 = vset.pattern.permute.xlu0 (!%p185_p12), %v734_v4  ;;  %661 = vset.pattern.permute.xlu1 (!%p185_p12), %v734_v4  ;;  %s193_s8 = scalar_lea.vmem (!%p185_p12), [#allocation2], %s559_s5  ;;  %v570_v8 = vld [vmem:[%s899_s2 + $0x20] sm:$0xff] (!%p185_p12)  ;;  %v578_v10 = vunpack.c.l.bf16 (!%p185_p12), %v580_v9  ;;  %v566_v12 = vld [vmem:[%s899_s2 + $0x18] sm:$0xff] (!%p185_p12)  ;;  %v579_v24 = vunpack.c.h.bf16 (!%p185_p12), %v580_v9  ;;  %v735_v25 = vmov (!%p185_p12), 0.0|0.0   ;;  %v569_v34 = vld [vmem:[%s898_s1 + $0x10] sm:$0xf] (!%p185_p12) }
  0x20   : > { %v662_v5 = vld [vmem:[%s193_s8] sm:$0xff] (!%p185_p12)   ;;  %222 = vperm.xlu0 (!%p185_p12), %660, %v218_v3   ;;  %298 = vperm.xlu1 (!%p185_p12), %661, %v565_v11   ;;  %v391_v36 = vunpack.c.l.bf16 (!%p185_p12), %v569_v34  ;;  %s573_s6 = sshll.u32 (!%p185_p12), %s552_s16, 4  ;;  %s212_s7 = scalar_lea.vmem (!%p185_p12), [#allocation3], %s814_s4 }
  0x21   : > { %591 = vmatpush3.bf16.msra.mxu0 (!%p185_p12), %v662_v5  ;;  %600 = vmatprep.mubr.msk.f32.mxu1 (!%p185_p12), %vm241_vm1, %v578_v10  ;;  %s492_s8 = sshll.u32 (!%p185_p12), %s212_s7, 4  ;;  %s853_s11 = scalar_lea.hbm (!%p185_p12), %s900_s3, %s573_s6  ;;  %s855_s8 = int_to_ptr.vmem [resolvable:$true] %s492_s8 }
  0x22   : > { %s480_s17 = scalar_lea.sflag (!%p185_p12), [#allocation4], %s814_s4  ;;  %s668_s19 = scalar_lea.vmem (!%p185_p12), %s855_s8, 16 }
  0x23   : > { %p669_p13 = scmp.ne.s32.totalorder (!%p185_p12), %s855_s8, %s668_s19  ;;  %s736_s16 = smov (!%p185_p12), [#allocation3]  }
  0x24   : > { %227 = vperm.xlu0 (!%p185_p12), %660, %v219_v7   ;;  %593 = vmatmul.mubr.msk.bf16.vlgmr.msra.gmra.mrb[0].mxu0 (!%p185_p12), %vm241_vm1, %v663_v6  ;;  %s672_s20 = sshll.u32 (!%p185_p12), %s736_s16, 4  ;;  %s673_s20 = int_to_ptr.vmem [resolvable:$false] %s672_s20 }
  0x25   : > { %303 = vperm.xlu1 %661, %v566_v12   ;;  %p670_p0 = pnand %p669_p13, %p795_p6  ;;  %s674_s24 = scalar_lea.vmem %s673_s20, 32 }
  0x26   : > { %p675_p2 = scmp.lt.s32.totalorder %s855_s8, %s673_s20  ;;  %p676_p3 = scmp.lt.s32.totalorder %s674_s24, %s668_s19 }
  0x27   : > { %p671_p1 = pneg %p670_p0 }
  0x28   : > { %396 = vperm.xlu0 %660, %v570_v8   ;;  %p677_p4 = por %p676_p3, %p675_p2 }
  0x2a   : > { %p678_p5 = pnand %p677_p4, %p671_p1 }
  0x9f   : > { %v223_v13 = vpop.permute.xlu0 %222  ;;  %v299_v26 = vpop.permute.xlu1 %298 }
  0xa3   : > { %v228_v17 = vpop.permute.xlu0 %227 }
  0xa4   : > { %v304_v27 = vpop.permute.xlu1 %303 }
  0xa7   : > { %v397_v37 = vpop.permute.xlu0 %396 }
  0xf7   : > { %v279_v14 = vpop.f32.mrb[0].mxu0 }
  0xf8   : > { %v280_v15 = vadd.f32 %v279_v14, %v223_v13  ;;  %v594_v16 = vpop.f32.mrb[1].mxu0 }
  0xf9   : > { %v282_v18 = vpop.f32.mrb[2].mxu0 }
  0xfa   : > { %v283_v19 = vadd.f32 %v282_v18, %v228_v17  ;;  %v595_v20 = vpop.f32.mrb[3].mxu0  ;;  %v286_v21 = vmax.f32 %v280_v15, 0.0 }
  0xfc   : > { %v287_v22 = vmax.f32 %v283_v19, 0.0 }
  0xfe   : > { %v610_v23 = vpack.c.bf16 %v287_v22, %v286_v21 }
 0x100   : > { %611 = vmatprep.subr.bf16.mxu1 %v610_v23 }
 0x101   : > { %613 = vmatpush3.bf16.msra.mxu1 %v610_v23 }
 0x102   : > { %614 = vmatprep.subr.bf16.mxu1 %v735_v25 }
 0x104   : > { %601 = vmatmul.mubr.msk.f32.vlgmr.msra.gmra.mrb[0].mxu1 %vm241_vm1, %v579_v24 }
 0x105   : > { %607 = vmatprep.mubr.msk.f32.mxu1 %vm733_vm0, %v732_v2 }
 0x1d7   : > { %v602_v28 = vpop.f32.mrb[0].mxu1 }
 0x1d8   : > { %v384_v29 = vadd.f32 %v602_v28, %v304_v27  ;;  %v378_v30 = vpop.f32.mrb[1].mxu1 }
 0x1d9   : > { %v379_v31 = vadd.f32 %v378_v30, %v299_v26 }
 0x1da   : > { %v388_v32 = vmax.f32 %v384_v29, 0.0 }
 0x1db   : > { %v387_v33 = vmax.f32 %v379_v31, 0.0 }
 0x1dd   : > { %v615_v35 = vpack.c.bf16 %v388_v32, %v387_v33 }
 0x1df   : > { %616 = vmatpush3.bf16.msra.mxu1 %v615_v35 }
 0x1e2   : > { %608 = vmatmul.mubr.msk.f32.vlgmr.msra.gmra.mrb[2].mxu1 %vm241_vm1, %v391_v36 }
 0x2b5   : > { %v468_v38 = vpop.f32.mrb[2].mxu1 }
 0x2b6   : > { %v469_v39 = vadd.f32 %v468_v38, %v397_v37  ;;  %v609_v40 = vpop.f32.mrb[3].mxu1 }
 0x2b8   : > { %v572_v41 = vmul.f32 -1.442695, %v469_v39 }
 0x2ba   : > { %664 = vpow2.f32 %v572_v41 }
 0x2c4   : > { %v665_v42 = vpop.eup %664 }
 0x2c5   : > { %v475_v43 = vadd.f32 1.0, %v665_v42 }
 0x2c7   : > { %666 = vrcp.f32 %v475_v43 }
 0x2d1   : > { %v667_v44 = vpop.eup %666 }
 0x2d2   : > { %478 = vst [vmem:[%s212_s7] sm:$0x1] %v667_v44 }
 0x2d3   : > { %681 = shalt.err (!%p678_p5)
}
 0x2d4   : > { %s682_s4 = scalar_lea.hbm %s853_s11, 16  ;;  %s686_s27 = scalar_lea.hbm %s900_s3, 32 }
 0x2d5   : > { %p683_p7 = scmp.ne.s32.totalorder %s853_s11, %s682_s4  ;;  %p687_p12 = scmp.lt.u32.totalorder %s853_s11, %s900_s3 }
 0x2d6   : > { %p688_p13 = scmp.lt.u32.totalorder %s686_s27, %s682_s4  ;;  %p690_p1 = scmp.lt.u32.totalorder %s682_s4, %s853_s11 }
 0x2d7   : > { %p684_p10 = pnand %p683_p7, %p795_p6 }
 0x2d8   : > { %p689_p0 = por %p688_p13, %p687_p12 }
 0x2d9   : > { %p685_p11 = pneg %p684_p10 }
 0x2da   : > { %p691_p2 = por %p690_p1, %p689_p0 }
 0x2dc   : > { %p692_p3 = pnand %p691_p2, %p685_p11 }
 0x2de   : > { %695 = shalt.err (!%p692_p3)
}
 0x2df   : > { %617 = dma.vmem_to_hbm [thread:$0]  (%p795_p6), %s855_s8, 16, %s853_s11, %s480_s17  }
 0x2e0 PF: > { %s504_s30 = sand.u32 1, %s718_s12   ;;  %p620_p4 = pnand %p555_p9, %p799_p8 }
 0x2e1   : > { %s505_s5 = scalar_lea.sflag [#allocation4], %s504_s30 }
 0x2e2   : > { %713 = dma.done.wait (!%p620_p4), %s505_s5, 16  }
 0x2e3   : > { %715 = vsyncadd (!%p620_p4), %s505_s5, 4294967280  ;;  %p13_p5 = scmp.ge.s32.totalorder %s780_s18, 4   ;;  %s903_s12 = smov %s722_s13 }
 0x2e4   : > { %s904_s13 = smov %s726_s14  ;;  %s905_s14 = smov %s793_s21 }
 0x2e5   : > { %s906_s15 = smov %s780_s18  ;;  %15 = sbr.rel (!%p13_p5) target bundleno = 3 (0x3), region = 117 }
 0x2ec   :  { %509 = vsyncpa [#allocation4], 1 }
 0x2ed   :  { %511 = vsyncpa [#allocation4 + $0x1], 1 }

</bundles_post_ra>
